<compile_context>
chip_gen: v5e
topology: v5e:2x2
jax: 0.10.0
libtpu: 0.0.40
codegen_flags: <defaults>
</compile_context>

<pallas_src>
import math

import jax
import jax.numpy as jnp
from jax.experimental import pallas as pl
from jax.experimental.pallas import tpu as pltpu


def _round_up(n: int, m: int) -> int:
    return ((n + m - 1) // m) * m


# ----------------------------------------------------------------------------
# Pallas kernel: whole Network forward for one batch tile.
# ----------------------------------------------------------------------------
def network_kernel(
    x_ref,        # [TB, in_dim]          f32 (cast to compute dtype in-kernel)
    w_feat_ref,   # [in_dim, 128]         compute dtype
    b_feat_ref,   # [1, 128]              f32
    w_hid_ref,    # [128, 256]            compute dtype = [w_ah | w_vh]
    b_hid_ref,    # [1, 256]              f32           = [b_ah | b_vh]
    w_out_ref,    # [256, head_n]         compute dtype, block-diag, lane-padded
    b_out_ref,    # [1, head_n]           f32           = [b_a | b_v | 0...]
    q_ref,        # [TB, out_dim]         f32 output
):
    out_dim = q_ref.shape[-1]
    cdt = w_feat_ref.dtype  # MXU operand dtype (bf16 by default, or f32)

    # Cast activations per-tile (free VPU op; avoids a wrapper-side HBM pass).
    x = x_ref[...].astype(cdt)

    # feature = ReLU(x @ W_feat + b_feat)                      -> [TB, 128]
    feat = jnp.dot(x, w_feat_ref[...], preferred_element_type=jnp.float32)
    feat = jnp.maximum(feat + b_feat_ref[...], 0.0)

    # fused advantage/value hidden layer: [adv_hid | val_hid]  -> [TB, 256]
    hid = jnp.dot(feat.astype(cdt), w_hid_ref[...],
                  preferred_element_type=jnp.float32)
    hid = jnp.maximum(hid + b_hid_ref[...], 0.0)

    # fused, lane-padded block-diagonal head                   -> [TB, head_n]
    #   lanes [0, out_dim)   : advantage
    #   lane  out_dim        : value
    #   lanes (out_dim, 128) : exactly zero (zero weight columns, zero bias)
    head = (
        jnp.dot(hid.astype(cdt), w_out_ref[...],
                preferred_element_type=jnp.float32)
        + b_out_ref[...]
    )

    lane = jax.lax.broadcasted_iota(jnp.int32, head.shape, 1)
    value = jnp.sum(jnp.where(lane == out_dim, head, 0.0),
                    axis=-1, keepdims=True)                    # [TB, 1]
    total = jnp.sum(head, axis=-1, keepdims=True)              # adv_sum + value
    adv_mean = (total - value) * (1.0 / out_dim)               # divide by out_dim!

    # dueling combine: q = V + A - mean(A); only first out_dim lanes are valid.
    q = value + head - adv_mean
    q_ref[...] = q[:, :out_dim].astype(q_ref.dtype)


# ----------------------------------------------------------------------------
# Wrapper: fuses weights, picks the batch tile, sets up the parallel batch grid.
# ----------------------------------------------------------------------------
def network_forward(x, params, *, compute_dtype=jnp.bfloat16, block_b=2048,
                    min_grid=2):
    B, in_dim = x.shape
    out_dim = params["w_a"].shape[1]
    head_n = _round_up(out_dim + 1, 128)   # lane-aligned fused head width

    # --- fuse branch weights (done once, outside the kernel) -----------------
    w_feat = params["w_feat"].astype(compute_dtype)              # [in_dim, 128]
    b_feat = params["b_feat"]                                    # [1, 128] f32

    w_hid = jnp.concatenate(
        [params["w_ah"], params["w_vh"]], axis=1).astype(compute_dtype)  # [128,256]
    b_hid = jnp.concatenate([params["b_ah"], params["b_vh"]], axis=1)    # [1,256] f32

    w_out = jnp.zeros((256, head_n), jnp.float32)
    w_out = w_out.at[:128, :out_dim].set(params["w_a"])          # adv block
    w_out = w_out.at[128:, out_dim].set(params["w_v"][:, 0])     # value column
    w_out = w_out.astype(compute_dtype)                          # [256, head_n]
    b_out = jnp.zeros((1, head_n), jnp.float32)
    b_out = b_out.at[:, :out_dim].set(params["b_a"])
    b_out = b_out.at[:, out_dim].set(params["b_v"][0, 0])        # [1, head_n] f32

    # --- batch tiling: no jnp.pad; partial tail block handled by Pallas ------
    # Tile is large (amortizes ~0.35us/step) but capped so the grid has at least
    # `min_grid` steps (lets v7x shard batch tiles over both TensorCores) and
    # stays well under v5e's 16 MiB scoped VMEM even at tb=2048.
    tb = max(8, min(block_b, _round_up(-(-B // min_grid), 8)))
    grid = (pl.cdiv(B, tb),)

    return pl.pallas_call(
        network_kernel,
        out_shape=jax.ShapeDtypeStruct((B, out_dim), jnp.float32),
        grid_spec=pltpu.PrefetchScalarGridSpec(
            num_scalar_prefetch=0,
            grid=grid,
            in_specs=[
                pl.BlockSpec((tb, in_dim), lambda i: (i, 0)),       # x tile (f32)
                pl.BlockSpec((in_dim, 128), lambda i: (0, 0)),      # w_feat
                pl.BlockSpec((1, 128), lambda i: (0, 0)),           # b_feat
                pl.BlockSpec((128, 256), lambda i: (0, 0)),         # w_hid
                pl.BlockSpec((1, 256), lambda i: (0, 0)),           # b_hid
                pl.BlockSpec((256, head_n), lambda i: (0, 0)),      # w_out
                pl.BlockSpec((1, head_n), lambda i: (0, 0)),        # b_out
            ],
            out_specs=pl.BlockSpec((tb, out_dim), lambda i: (i, 0)),
        ),
        compiler_params=pltpu.CompilerParams(
            dimension_semantics=("parallel",)),
    )(x, w_feat, b_feat, w_hid, b_hid, w_out, b_out)


# ----------------------------------------------------------------------------
# Deterministic parameter construction (mirrors the PyTorch __init__)
# ----------------------------------------------------------------------------
def _scale_noise(key, size):
    # f(x) = sign(x) * sqrt(|x|), x ~ N(0, 1)
    x = jax.random.normal(key, (size,), dtype=jnp.float32)
    return jnp.sign(x) * jnp.sqrt(jnp.abs(x))


def _noisy_linear_params(key, in_features, out_features, std_init=0.5):
    """Returns effective (W[in,out], b[1,out]) with factorized noise folded in."""
    k_wmu, k_bmu, k_ein, k_eout = jax.random.split(key, 4)
    mu_range = 1.0 / math.sqrt(in_features)

    weight_mu = jax.random.uniform(
        k_wmu, (out_features, in_features), jnp.float32, -mu_range, mu_range
    )
    weight_sigma = jnp.full(
        (out_features, in_features), std_init / math.sqrt(in_features), jnp.float32
    )
    bias_mu = jax.random.uniform(
        k_bmu, (out_features,), jnp.float32, -mu_range, mu_range
    )
    bias_sigma = jnp.full(
        (out_features,), std_init / math.sqrt(out_features), jnp.float32
    )

    eps_in = _scale_noise(k_ein, in_features)
    eps_out = _scale_noise(k_eout, out_features)
    weight_epsilon = jnp.outer(eps_out, eps_in)
    bias_epsilon = eps_out

    w_eff = weight_mu + weight_sigma * weight_epsilon          # [out, in]
    b_eff = bias_mu + bias_sigma * bias_epsilon                # [out]
    return w_eff.T, b_eff.reshape(1, out_features)             # [in, out], [1, out]


def make_params(key, in_dim, out_dim):
    k_feat, k_ah, k_a, k_vh, k_v = jax.random.split(key, 5)

    # feature layer: nn.Linear(in_dim, 128), xavier_uniform_ weight, bias = 0
    bound = math.sqrt(6.0 / (in_dim + 128))
    w_feat_pt = jax.random.uniform(
        k_feat, (128, in_dim), jnp.float32, -bound, bound
    )
    w_feat = w_feat_pt.T                              # [in_dim, 128]
    b_feat = jnp.zeros((1, 128), jnp.float32)

    w_ah, b_ah = _noisy_linear_params(k_ah, 128, 128)
    w_a, b_a = _noisy_linear_params(k_a, 128, out_dim)
    w_vh, b_vh = _noisy_linear_params(k_vh, 128, 128)
    w_v, b_v = _noisy_linear_params(k_v, 128, 1)

    return dict(
        w_feat=w_feat, b_feat=b_feat,
        w_ah=w_ah, b_ah=b_ah,
        w_a=w_a, b_a=b_a,
        w_vh=w_vh, b_vh=b_vh,
        w_v=w_v, b_v=b_v,
    )


# Pure-JAX reference for sanity checks.
def network_forward_ref(x, p):
    feat = jnp.maximum(x @ p["w_feat"] + p["b_feat"], 0.0)
    adv_hid = jnp.maximum(feat @ p["w_ah"] + p["b_ah"], 0.0)
    val_hid = jnp.maximum(feat @ p["w_vh"] + p["b_vh"], 0.0)
    adv = adv_hid @ p["w_a"] + p["b_a"]
    val = val_hid @ p["w_v"] + p["b_v"]
    return val + adv - jnp.mean(adv, axis=-1, keepdims=True)


if __name__ == "__main__":
    key = jax.random.PRNGKey(0)
    k_param, k_x, k_xb = jax.random.split(key, 3)

    in_dim, out_dim, batch = 32, 8, 2
    params = make_params(k_param, in_dim, out_dim)

    # --- small batch, f32 compute path (exact check; partial 8-row block) ----
    x = jax.random.normal(k_x, (batch, in_dim), dtype=jnp.float32)
    q = jax.block_until_ready(
        network_forward(x, params, compute_dtype=jnp.float32))
    q_ref = network_forward_ref(x, params)
    assert q.shape == (batch, out_dim)
    assert jnp.allclose(q, q_ref, atol=1e-4, rtol=1e-4), (q, q_ref)

    # --- larger batch, DEFAULT bf16 MXU path, default tile (partial tail) ----
    xb = jax.random.normal(k_xb, (130, in_dim), dtype=jnp.float32)
    qb_ref = network_forward_ref(xb, params)
    qb = jax.block_until_ready(network_forward(xb, params))
    assert qb.shape == (130, out_dim)
    assert jnp.allclose(qb, qb_ref, atol=1e-1, rtol=1e-1)

    # --- multi-tile grid with partial tail block (bf16), small forced tile ---
    qm = jax.block_until_ready(network_forward(xb, params, block_b=64))
    assert qm.shape == (130, out_dim)
    assert jnp.allclose(qm, qb_ref, atol=1e-1, rtol=1e-1)

    # --- f32 path on the larger batch: tight check of fused-head packing -----
    qf = jax.block_until_ready(
        network_forward(xb, params, compute_dtype=jnp.float32, block_b=64))
    assert jnp.allclose(qf, qb_ref, atol=1e-4, rtol=1e-4)

    print("KERNEL_OK")
</pallas_src>

<mosaic_0001>
module attributes {stable_mosaic.version = 11 : i64} {
  func.func @network_kernel(%arg0: i32, %arg1: memref<8x32xf32, #tpu.memory_space<vmem>>, %arg2: memref<32x128xf32, #tpu.memory_space<vmem>>, %arg3: memref<1x128xf32, #tpu.memory_space<vmem>>, %arg4: memref<128x256xf32, #tpu.memory_space<vmem>>, %arg5: memref<1x256xf32, #tpu.memory_space<vmem>>, %arg6: memref<256x128xf32, #tpu.memory_space<vmem>>, %arg7: memref<1x128xf32, #tpu.memory_space<vmem>>, %arg8: memref<8x8xf32, #tpu.memory_space<vmem>>) attributes {dimension_semantics = [#tpu.dimension_semantics<parallel>], iteration_bounds = array<i64: 1>, scalar_prefetch = 0 : i64, scratch_operands = 0 : i64, tpu.core_type = #tpu.core_type<tc>, window_params = [{transform_indices = @transform_0, window_bounds = array<i64: 8, 32>}, {pipeline_mode = #tpu.pipeline_mode<synchronous>, transform_indices = @transform_1, window_bounds = array<i64: 32, 128>}, {pipeline_mode = #tpu.pipeline_mode<synchronous>, transform_indices = @transform_2, window_bounds = array<i64: 1, 128>}, {pipeline_mode = #tpu.pipeline_mode<synchronous>, transform_indices = @transform_3, window_bounds = array<i64: 128, 256>}, {pipeline_mode = #tpu.pipeline_mode<synchronous>, transform_indices = @transform_4, window_bounds = array<i64: 1, 256>}, {pipeline_mode = #tpu.pipeline_mode<synchronous>, transform_indices = @transform_5, window_bounds = array<i64: 256, 128>}, {pipeline_mode = #tpu.pipeline_mode<synchronous>, transform_indices = @transform_6, window_bounds = array<i64: 1, 128>}, {transform_indices = @transform_7, window_bounds = array<i64: 8, 8>}]} {
    %c0 = arith.constant 0 : index
    %c0_0 = arith.constant 0 : index
    %0 = vector.load %arg1[%c0, %c0_0] : memref<8x32xf32, #tpu.memory_space<vmem>>, vector<8x32xf32>
    %c0_1 = arith.constant 0 : index
    %c0_2 = arith.constant 0 : index
    %1 = vector.load %arg2[%c0_1, %c0_2] : memref<32x128xf32, #tpu.memory_space<vmem>>, vector<32x128xf32>
    %cst = arith.constant dense<0.000000e+00> : vector<8x128xf32>
    %2 = tpu.matmul %0, %1, %cst {dimension_numbers = #tpu.dot_dimension_numbers<[1], [0], [0], [1], [0, 0, 1, 1], [], []>} : vector<8x32xf32>, vector<32x128xf32>, vector<8x128xf32> -> vector<8x128xf32>
    %c0_3 = arith.constant 0 : index
    %c0_4 = arith.constant 0 : index
    %3 = vector.load %arg3[%c0_3, %c0_4] : memref<1x128xf32, #tpu.memory_space<vmem>>, vector<1x128xf32>
    %4 = vector.broadcast %3 : vector<1x128xf32> to vector<8x128xf32>
    %5 = arith.addf %2, %4 : vector<8x128xf32>
    %cst_5 = arith.constant 0.000000e+00 : f32
    %6 = vector.broadcast %cst_5 : f32 to vector<8x128xf32>
    %7 = arith.maximumf %5, %6 : vector<8x128xf32>
    %c0_6 = arith.constant 0 : index
    %c0_7 = arith.constant 0 : index
    %8 = vector.load %arg4[%c0_6, %c0_7] : memref<128x256xf32, #tpu.memory_space<vmem>>, vector<128x256xf32>
    %cst_8 = arith.constant dense<0.000000e+00> : vector<8x256xf32>
    %9 = tpu.matmul %7, %8, %cst_8 {dimension_numbers = #tpu.dot_dimension_numbers<[1], [0], [0], [1], [0, 0, 1, 1], [], []>} : vector<8x128xf32>, vector<128x256xf32>, vector<8x256xf32> -> vector<8x256xf32>
    %c0_9 = arith.constant 0 : index
    %c0_10 = arith.constant 0 : index
    %10 = vector.load %arg5[%c0_9, %c0_10] : memref<1x256xf32, #tpu.memory_space<vmem>>, vector<1x256xf32>
    %11 = vector.broadcast %10 : vector<1x256xf32> to vector<8x256xf32>
    %12 = arith.addf %9, %11 : vector<8x256xf32>
    %cst_11 = arith.constant 0.000000e+00 : f32
    %13 = vector.broadcast %cst_11 : f32 to vector<8x256xf32>
    %14 = arith.maximumf %12, %13 : vector<8x256xf32>
    %c0_12 = arith.constant 0 : index
    %c0_13 = arith.constant 0 : index
    %15 = vector.load %arg6[%c0_12, %c0_13] : memref<256x128xf32, #tpu.memory_space<vmem>>, vector<256x128xf32>
    %cst_14 = arith.constant dense<0.000000e+00> : vector<8x128xf32>
    %16 = tpu.matmul %14, %15, %cst_14 {dimension_numbers = #tpu.dot_dimension_numbers<[1], [0], [0], [1], [0, 0, 1, 1], [], []>} : vector<8x256xf32>, vector<256x128xf32>, vector<8x128xf32> -> vector<8x128xf32>
    %c0_15 = arith.constant 0 : index
    %c0_16 = arith.constant 0 : index
    %17 = vector.load %arg7[%c0_15, %c0_16] : memref<1x128xf32, #tpu.memory_space<vmem>>, vector<1x128xf32>
    %18 = vector.broadcast %17 : vector<1x128xf32> to vector<8x128xf32>
    %19 = arith.addf %16, %18 : vector<8x128xf32>
    %20 = tpu.iota {dimensions = array<i32: 1>} : vector<8x128xi32>
    %c8_i32 = arith.constant 8 : i32
    %21 = vector.broadcast %c8_i32 : i32 to vector<8x128xi32>
    %22 = arith.cmpi eq, %20, %21 : vector<8x128xi32>
    %cst_17 = arith.constant 0.000000e+00 : f32
    %23 = vector.broadcast %cst_17 : f32 to vector<8x128xf32>
    %24 = arith.select %22, %19, %23 : vector<8x128xi1>, vector<8x128xf32>
    %cst_18 = arith.constant dense<0.000000e+00> : vector<8xf32>
    %25 = vector.multi_reduction <add>, %24, %cst_18 [1] : vector<8x128xf32> to vector<8xf32>
    %26 = vector.shape_cast %25 : vector<8xf32> to vector<8x1xf32>
    %cst_19 = arith.constant dense<0.000000e+00> : vector<8xf32>
    %27 = vector.multi_reduction <add>, %19, %cst_19 [1] : vector<8x128xf32> to vector<8xf32>
    %28 = vector.shape_cast %27 : vector<8xf32> to vector<8x1xf32>
    %29 = arith.subf %28, %26 : vector<8x1xf32>
    %cst_20 = arith.constant 1.250000e-01 : f32
    %30 = vector.broadcast %cst_20 : f32 to vector<8x1xf32>
    %31 = arith.mulf %29, %30 : vector<8x1xf32>
    %32 = vector.broadcast %26 : vector<8x1xf32> to vector<8x128xf32>
    %33 = arith.addf %32, %19 : vector<8x128xf32>
    %34 = vector.broadcast %31 : vector<8x1xf32> to vector<8x128xf32>
    %35 = arith.subf %33, %34 : vector<8x128xf32>
    %36 = vector.extract_strided_slice %35 {offsets = [0, 0], sizes = [8, 8], strides = [1, 1]} : vector<8x128xf32> to vector<8x8xf32>
    %c0_21 = arith.constant 0 : index
    %c0_22 = arith.constant 0 : index
    %37 = vector.load %arg8[%c0_21, %c0_22] : memref<8x8xf32, #tpu.memory_space<vmem>>, vector<8x8xf32>
    tpu.vector_store %arg8[%c0_21, %c0_22], %36 {strides = array<i32>} : memref<8x8xf32, #tpu.memory_space<vmem>>, vector<8x8xf32>,
    return
  }
  func.func @transform_0(%arg0: i32) -> (i32, i32) {
    %c0_i32 = arith.constant 0 : i32
    %c0_i32_0 = arith.constant 0 : i32
    return %arg0, %c0_i32 : i32, i32
  }
  func.func @transform_1(%arg0: i32) -> (i32, i32) {
    %c0_i32 = arith.constant 0 : i32
    %c0_i32_0 = arith.constant 0 : i32
    %c0_i32_1 = arith.constant 0 : i32
    return %c0_i32, %c0_i32_0 : i32, i32
  }
  func.func @transform_2(%arg0: i32) -> (i32, i32) {
    %c0_i32 = arith.constant 0 : i32
    %c0_i32_0 = arith.constant 0 : i32
    %c0_i32_1 = arith.constant 0 : i32
    return %c0_i32, %c0_i32_0 : i32, i32
  }
  func.func @transform_3(%arg0: i32) -> (i32, i32) {
    %c0_i32 = arith.constant 0 : i32
    %c0_i32_0 = arith.constant 0 : i32
    %c0_i32_1 = arith.constant 0 : i32
    return %c0_i32, %c0_i32_0 : i32, i32
  }
  func.func @transform_4(%arg0: i32) -> (i32, i32) {
    %c0_i32 = arith.constant 0 : i32
    %c0_i32_0 = arith.constant 0 : i32
    %c0_i32_1 = arith.constant 0 : i32
    return %c0_i32, %c0_i32_0 : i32, i32
  }
  func.func @transform_5(%arg0: i32) -> (i32, i32) {
    %c0_i32 = arith.constant 0 : i32
    %c0_i32_0 = arith.constant 0 : i32
    %c0_i32_1 = arith.constant 0 : i32
    return %c0_i32, %c0_i32_0 : i32, i32
  }
  func.func @transform_6(%arg0: i32) -> (i32, i32) {
    %c0_i32 = arith.constant 0 : i32
    %c0_i32_0 = arith.constant 0 : i32
    %c0_i32_1 = arith.constant 0 : i32
    return %c0_i32, %c0_i32_0 : i32, i32
  }
  func.func @transform_7(%arg0: i32) -> (i32, i32) {
    %c0_i32 = arith.constant 0 : i32
    %c0_i32_0 = arith.constant 0 : i32
    return %arg0, %c0_i32 : i32, i32
  }
}

</mosaic_0001>

<bundles_post_ra>
// kernel: tpu_custom_call.1
= control target key start
LH: loop header
LB: loop body
LE: loop exit
PB: predicated region body
PF: predicated region fallthrough
CT: control target
= control target key end

     0   :  { %12 = vsyncpa [#allocation3], 0  ;;  %s538_s0 = inlined_call_operand.hbm [shape: f32[2,32], index: 0, kind: input, shape index: {}]   ;;  %s539_s1 = inlined_call_operand.hbm [shape: f32[32,128], index: 1, kind: input, shape index: {}]   ;;  %s540_s2 = inlined_call_operand.vmem [shape: f32[1,128], index: 2, kind: input, shape index: {}]   ;;  %s541_s3 = inlined_call_operand.hbm [shape: f32[128,256], index: 3, kind: input, shape index: {}]   ;;  %s542_s4 = inlined_call_operand.vmem [shape: f32[1,256], index: 4, kind: input, shape index: {}]   ;;  %s543_s5 = inlined_call_operand.hbm [shape: f32[256,128], index: 5, kind: input, shape index: {}]   ;;  %s544_s6 = inlined_call_operand.vmem [shape: f32[1,128], index: 6, kind: input, shape index: {}]   ;;  %s545_s7 = inlined_call_operand.hbm [shape: f32[2,8], index: 7, kind: output, shape index: {}]  }
   0x1   :  { %13 = vsyncpa [#allocation6], 0 }
   0x2   :  { %14 = vsyncpa [#allocation9], 0 }
   0x3   :  { %15 = vsyncpa [#allocation4], 0  ;;  %s33_s26 = sshll.u32 %s539_s1, 4  ;;  %s34_s26 = int_to_ptr.hbm [resolvable:$true] %s33_s26 }
   0x4   :  { %19 = vsyncadd [#allocation3], 96  ;;  %s457_s27 = smov [#allocation5]   ;;  %s20_s8 = sshll.u32 %s538_s0, 4  ;;  %s21_s8 = int_to_ptr.hbm [resolvable:$true] %s20_s8 }
   0x5   :  { %s35_s28 = sshll.u32 %s457_s27, 4  ;;  %s458_s9 = smov 128   ;;  %s36_s28 = int_to_ptr.vmem [resolvable:$true] %s35_s28 }
   0x6   :  { %s459_s10 = smov 8   ;;  %s460_s11 = smov [#allocation2]  }
   0x7   :  { %41 = dma.hbm_to_vmem [thread:$0]  %s34_s26, 512, %s36_s28, [#allocation6], %s458_s9, %s458_s9, %s459_s10  }
   0x8   :  { %s22_s12 = sshll.u32 %s460_s11, 4  ;;  %s461_s13 = smov 32   ;;  %s23_s12 = int_to_ptr.vmem [resolvable:$true] %s22_s12 }
   0x9   :  { %s462_s14 = smov 2   ;;  %s48_s16 = sshll.u32 %s541_s3, 4  ;;  %s49_s16 = int_to_ptr.hbm [resolvable:$true] %s48_s16 }
   0xa   :  { %28 = dma.hbm_to_vmem [thread:$0]  %s21_s8, 32, %s23_s12, [#allocation3], %s461_s13, %s461_s13, %s462_s14  }
   0xb   :  { %s463_s17 = smov [#allocation7]   ;;  %s63_s20 = sshll.u32 %s543_s5, 4  ;;  %s64_s20 = int_to_ptr.hbm [resolvable:$true] %s63_s20 }
   0xc   :  { %s50_s0 = sshll.u32 %s463_s17, 4  ;;  %s464_s21 = smov 256   ;;  %s51_s0 = int_to_ptr.vmem [resolvable:$true] %s50_s0 }
   0xd   :  { %s465_s22 = smov 16   ;;  %s466_s23 = smov [#allocation8]  }
   0xe   :  { %56 = dma.hbm_to_vmem [thread:$0]  %s49_s16, 4096, %s51_s0, [#allocation6], %s464_s21, %s464_s21, %s465_s22  }
   0xf   :  { %s65_s24 = sshll.u32 %s466_s23, 4  ;;  %s66_s24 = int_to_ptr.vmem [resolvable:$true] %s65_s24 }
  0x10   :  { %71 = dma.hbm_to_vmem [thread:$0]  %s64_s20, 4096, %s66_s24, [#allocation9], %s458_s9, %s458_s9, %s459_s10  }
  0x11   :  { %449 = dma.done.wait [#allocation3], 128  }
  0x12   :  { %450 = vsyncadd [#allocation3], 4294967168 }
  0x13   :  { %451 = dma.done.wait [#allocation6], 4608  }
  0x14   :  { %452 = vsyncadd [#allocation6], 4294962688 }
  0x15   :  { %453 = dma.done.wait [#allocation9], 4096  }
  0x16   :  { %454 = vsyncadd [#allocation9], 4294963200  ;;  %v94_v0 = vld [vmem:[#allocation5 + $0x18] sm:$0xff]  ;;  %v93_v1 = vld [vmem:[#allocation5 + $0x10] sm:$0xff]  ;;  %vm99_vm0 = vcmask 261120   ;;  %vm292_vm2 = vcmask 64512  }
  0x17   :  { %115 = vmatpush.msra.mxu0 %v94_v0  ;;  %v92_v2 = vld [vmem:[#allocation5 + $0x8] sm:$0xff]  ;;  %v154_v3 = vld [vmem:[#allocation7 + $0xf0] sm:$0xff]  ;;  %v155_v4 = vld [vmem:[#allocation7 + $0xf8] sm:$0xff] }
  0x18   :  { %162 = vmatpush.msra.mxu1 %v154_v3  ;;  %v152_v5 = vld [vmem:[#allocation7 + $0xe0] sm:$0xff]  ;;  %v153_v6 = vld [vmem:[#allocation7 + $0xe8] sm:$0xff]  ;;  %182 = vmatpush.msra.mxu2 %v155_v4  ;;  %v150_v7 = vld [vmem:[#allocation7 + $0xd0] sm:$0xff] }
  0x19   :  { %116 = vmatpush.msra.mxu0 %v93_v1  ;;  %v91_v8 = vld [vmem:[#allocation5] sm:$0xff]  ;;  %v151_v9 = vld [vmem:[#allocation7 + $0xd8] sm:$0xff]  ;;  %v149_v12 = vld [vmem:[#allocation7 + $0xc8] sm:$0xff] }
  0x1a   :  { %163 = vmatpush.msra.mxu1 %v152_v5  ;;  %v90_v10 = vld [vmem:[#allocation2] sm:$0xff]  ;;  %183 = vmatpush.msra.mxu2 %v153_v6  ;;  %v148_v11 = vld [vmem:[#allocation7 + $0xc0] sm:$0xff]  ;;  %v146_v13 = vld [vmem:[#allocation7 + $0xb0] sm:$0xff] }
  0x1b   :  { %117 = vmatpush.msra.mxu0 %v92_v2  ;;  %v147_v14 = vld [vmem:[#allocation7 + $0xb8] sm:$0xff]  ;;  %v144_v15 = vld [vmem:[#allocation7 + $0xa0] sm:$0xff]  ;;  %v145_v16 = vld [vmem:[#allocation7 + $0xa8] sm:$0xff] }
  0x1c   :  { %164 = vmatpush.msra.mxu1 %v150_v7  ;;  %184 = vmatpush.msra.mxu2 %v151_v9  ;;  %v142_v17 = vld [vmem:[#allocation7 + $0x90] sm:$0xff]  ;;  %v143_v18 = vld [vmem:[#allocation7 + $0x98] sm:$0xff]  ;;  %v140_v19 = vld [vmem:[#allocation7 + $0x80] sm:$0xff] }
  0x1d   :  { %118 = vmatpush.msra.mxu0 %v91_v8  ;;  %v141_v20 = vld [vmem:[#allocation7 + $0x88] sm:$0xff]  ;;  %v138_v21 = vld [vmem:[#allocation7 + $0x70] sm:$0xff]  ;;  %v139_v22 = vld [vmem:[#allocation7 + $0x78] sm:$0xff] }
  0x1e   :  { %315 = vmatmul.msk.f32.vlgmr.msra.gmra.mxu0 %vm99_vm0, %v90_v10  ;;  %165 = vmatpush.msra.mxu1 %v148_v11  ;;  %v136_v23 = vld [vmem:[#allocation7 + $0x60] sm:$0xff]  ;;  %v137_v24 = vld [vmem:[#allocation7 + $0x68] sm:$0xff]  ;;  %v134_v25 = vld [vmem:[#allocation7 + $0x50] sm:$0xff] }
  0x1f   :  { %185 = vmatpush.msra.mxu2 %v149_v12  ;;  %v135_v26 = vld [vmem:[#allocation7 + $0x58] sm:$0xff]  ;;  %v132_v27 = vld [vmem:[#allocation7 + $0x40] sm:$0xff]  ;;  %v133_v28 = vld [vmem:[#allocation7 + $0x48] sm:$0xff] }
  0x20   :  { %166 = vmatpush.msra.mxu1 %v146_v13  ;;  %v130_v29 = vld [vmem:[#allocation7 + $0x30] sm:$0xff]  ;;  %v131_v30 = vld [vmem:[#allocation7 + $0x38] sm:$0xff]  ;;  %v128_v31 = vld [vmem:[#allocation7 + $0x20] sm:$0xff] }
  0x21   :  { %186 = vmatpush.msra.mxu2 %v147_v14  ;;  %v129_v32 = vld [vmem:[#allocation7 + $0x28] sm:$0xff]  ;;  %v126_v33 = vld [vmem:[#allocation7 + $0x10] sm:$0xff]  ;;  %v127_v34 = vld [vmem:[#allocation7 + $0x18] sm:$0xff] }
  0x22   :  { %167 = vmatpush.msra.mxu1 %v144_v15  ;;  %v124_v35 = vld [vmem:[#allocation7] sm:$0xff]  ;;  %v125_v36 = vld [vmem:[#allocation7 + $0x8] sm:$0xff]  ;;  %v219_v37 = vld [vmem:[#allocation8 + $0x78] sm:$0xff] }
  0x23   :  { %187 = vmatpush.msra.mxu2 %v145_v16  ;;  %v218_v38 = vld [vmem:[#allocation8 + $0x70] sm:$0xff]  ;;  %240 = vmatpush.msra.mxu3 %v219_v37  ;;  %v235_v39 = vld [vmem:[#allocation8 + $0xf8] sm:$0xff]  ;;  %v217_v40 = vld [vmem:[#allocation8 + $0x68] sm:$0xff] }
  0x24   :  { %168 = vmatpush.msra.mxu1 %v142_v17  ;;  %260 = vmatpush.msrb.mxu0 %v235_v39  ;;  %v234_v41 = vld [vmem:[#allocation8 + $0xf0] sm:$0xff]  ;;  %v233_v42 = vld [vmem:[#allocation8 + $0xe8] sm:$0xff]  ;;  %v216_v43 = vld [vmem:[#allocation8 + $0x60] sm:$0xff] }
  0x25   :  { %188 = vmatpush.msra.mxu2 %v143_v18  ;;  %241 = vmatpush.msra.mxu3 %v218_v38  ;;  %v232_v44 = vld [vmem:[#allocation8 + $0xe0] sm:$0xff]  ;;  %v215_v45 = vld [vmem:[#allocation8 + $0x58] sm:$0xff]  ;;  %v214_v47 = vld [vmem:[#allocation8 + $0x50] sm:$0xff]  ;;  %v280_v18 = vlaneseq }
  0x26   :  { %169 = vmatpush.msra.mxu1 %v140_v19  ;;  %261 = vmatpush.msrb.mxu0 %v234_v41  ;;  %v231_v46 = vld [vmem:[#allocation8 + $0xd8] sm:$0xff]  ;;  %v230_v48 = vld [vmem:[#allocation8 + $0xd0] sm:$0xff]  ;;  %v213_v49 = vld [vmem:[#allocation8 + $0x48] sm:$0xff] }
  0x27   :  { %189 = vmatpush.msra.mxu2 %v141_v20  ;;  %242 = vmatpush.msra.mxu3 %v217_v40  ;;  %v229_v50 = vld [vmem:[#allocation8 + $0xc8] sm:$0xff]  ;;  %v212_v51 = vld [vmem:[#allocation8 + $0x40] sm:$0xff]  ;;  %v211_v53 = vld [vmem:[#allocation8 + $0x38] sm:$0xff]  ;;  %v281_v20 = vand.u32 127, %v280_v18 }
  0x28   :  { %170 = vmatpush.msra.mxu1 %v138_v21  ;;  %262 = vmatpush.msrb.mxu0 %v233_v42  ;;  %v228_v52 = vld [vmem:[#allocation8 + $0xc0] sm:$0xff]  ;;  %v227_v54 = vld [vmem:[#allocation8 + $0xb8] sm:$0xff]  ;;  %v210_v55 = vld [vmem:[#allocation8 + $0x30] sm:$0xff] }
  0x29   :  { %190 = vmatpush.msra.mxu2 %v139_v22  ;;  %243 = vmatpush.msra.mxu3 %v216_v43  ;;  %v226_v56 = vld [vmem:[#allocation8 + $0xb0] sm:$0xff]  ;;  %v209_v57 = vld [vmem:[#allocation8 + $0x28] sm:$0xff]  ;;  %v208_v58 = vld [vmem:[#allocation8 + $0x20] sm:$0xff]  ;;  %vm282_vm1 = vcmp.eq.s32.totalorder %v281_v20, 8 }
  0x2a   :  { %171 = vmatpush.msra.mxu1 %v136_v23  ;;  %263 = vmatpush.msrb.mxu0 %v232_v44  ;;  %v207_v59 = vld [vmem:[#allocation8 + $0x18] sm:$0xff]  ;;  %v206_v0 = vld [vmem:[#allocation8 + $0x10] sm:$0xff]  ;;  %v225_v1 = vld [vmem:[#allocation8 + $0xa8] sm:$0xff] }
  0x2b   :  { %191 = vmatpush.msra.mxu2 %v137_v24  ;;  %244 = vmatpush.msra.mxu3 %v215_v45  ;;  %v327_v60 = vld [vmem:[%s540_s2] ss:$0 sm:$0xff]  ;;  %v205_v2 = vld [vmem:[#allocation8 + $0x8] sm:$0xff]  ;;  %v224_v3 = vld [vmem:[#allocation8 + $0xa0] sm:$0xff] }
  0x2c   :  { %172 = vmatpush.msra.mxu1 %v134_v25  ;;  %264 = vmatpush.msrb.mxu0 %v231_v46  ;;  %v204_v4 = vld [vmem:[#allocation8] sm:$0xff]  ;;  %v223_v5 = vld [vmem:[#allocation8 + $0x98] sm:$0xff]  ;;  %v222_v6 = vld [vmem:[#allocation8 + $0x90] sm:$0xff] }
  0x2d   :  { %192 = vmatpush.msra.mxu2 %v135_v26  ;;  %245 = vmatpush.msra.mxu3 %v214_v47  ;;  %v221_v7 = vld [vmem:[#allocation8 + $0x88] sm:$0xff]  ;;  %v220_v8 = vld [vmem:[#allocation8 + $0x80] sm:$0xff]  ;;  %v156_v9 = vld [vmem:[%s542_s4] sm:$0x3] }
  0x2e   :  { %173 = vmatpush.msra.mxu1 %v132_v27  ;;  %265 = vmatpush.msrb.mxu0 %v230_v48  ;;  %v158_v10 = vperm.slane %v156_v9, 0  ;;  %v159_v14 = vperm.slane %v156_v9, 1  ;;  %v328_v19 = vld [vmem:[%s544_s6] ss:$0 sm:$0xff] }
  0x2f   :  { %193 = vmatpush.msra.mxu2 %v133_v28  ;;  %246 = vmatpush.msra.mxu3 %v213_v49 }
  0x30   :  { %174 = vmatpush.msra.mxu1 %v130_v29  ;;  %266 = vmatpush.msrb.mxu0 %v229_v50 }
  0x31   :  { %194 = vmatpush.msra.mxu2 %v131_v30  ;;  %247 = vmatpush.msra.mxu3 %v212_v51 }
  0x32   :  { %175 = vmatpush.msra.mxu1 %v128_v31  ;;  %267 = vmatpush.msrb.mxu0 %v228_v52 }
  0x33   :  { %195 = vmatpush.msra.mxu2 %v129_v32  ;;  %248 = vmatpush.msra.mxu3 %v211_v53 }
  0x34   :  { %176 = vmatpush.msra.mxu1 %v126_v33  ;;  %268 = vmatpush.msrb.mxu0 %v227_v54 }
  0x35   :  { %196 = vmatpush.msra.mxu2 %v127_v34  ;;  %249 = vmatpush.msra.mxu3 %v210_v55 }
  0x36   :  { %177 = vmatpush.msra.mxu1 %v124_v35  ;;  %269 = vmatpush.msrb.mxu0 %v226_v56 }
  0x37   :  { %197 = vmatpush.msra.mxu2 %v125_v36  ;;  %250 = vmatpush.msra.mxu3 %v209_v57 }
  0x38   :  { %270 = vmatpush.msrb.mxu0 %v225_v1 }
  0x39   :  { %251 = vmatpush.msra.mxu3 %v208_v58 }
  0x3a   :  { %271 = vmatpush.msrb.mxu0 %v224_v3 }
  0x3b   :  { %252 = vmatpush.msra.mxu3 %v207_v59 }
  0x3c   :  { %272 = vmatpush.msrb.mxu0 %v223_v5 }
  0x3d   :  { %253 = vmatpush.msra.mxu3 %v206_v0 }
  0x3e   :  { %273 = vmatpush.msrb.mxu0 %v222_v6 }
  0x3f   :  { %254 = vmatpush.msra.mxu3 %v205_v2 }
  0x40   :  { %274 = vmatpush.msrb.mxu0 %v221_v7 }
  0x41   :  { %255 = vmatpush.msra.mxu3 %v204_v4 }
  0x42   :  { %275 = vmatpush.msrb.mxu0 %v220_v8 }
  0x9b   :  { %v120_v61 = vpop.f32.mrf.mxu0 }
  0x9c   :  { %v121_v62 = vadd.f32 %v327_v60, %v120_v61 }
  0x9e   :  { %v123_v63 = vmax.f32 %v121_v62, 0.0 }
  0xa0   :  { %178 = vmatmul.f32.vlgmr.msra.gmra.mxu1 %v123_v63  ;;  %198 = vmatmul.f32.vlgmr.msra.gmra.mxu2 %v123_v63 }
 0x11d   :  { %v179_v11 = vpop.f32.mrf.mxu1 }
 0x11e   :  { %v180_v12 = vadd.f32 %v179_v11, %v158_v10 }
 0x120   :  { %v202_v13 = vmax.f32 %v180_v12, 0.0 }
 0x122   :  { %256 = vmatmul.f32.vlgmr.msra.gmra.mxu3 %v202_v13 }
 0x123   :  { %v199_v15 = vpop.f32.mrf.mxu2 }
 0x124   :  { %v200_v16 = vadd.f32 %v199_v15, %v159_v14 }
 0x126   :  { %v203_v17 = vmax.f32 %v200_v16, 0.0 }
 0x128   :  { %276 = vmatmul.f32.vlgmr.msrb.gmra.mxu0 %v203_v17 }
 0x1a5   :  { %v257_v21 = vpop.f32.mrf.mxu3  ;;  %v277_v23 = vpop.f32.mrf.mxu0 }
 0x1a6   :  { %v258_v22 = vadd.f32 %v328_v19, %v257_v21 }
 0x1a8   :  { %v278_v24 = vadd.f32 %v277_v23, %v258_v22 }
 0x1aa   :  { %v283_v25 = vsel %vm282_vm1, %v278_v24, 0.0 }
 0x1ab   :  { %284 = vadd.xlane.f32.xlu0 %v283_v25 }
 0x1b3   :  { %286 = vadd.xlane.f32.xlu0 %v278_v24 }
 0x21e   :  { %v285_v26 = vpop.xlane.xlu0 %284 }
 0x21f   :  { %v290_v29 = vadd.f32 %v285_v26, %v278_v24 }
 0x226   :  { %v287_v27 = vpop.xlane.xlu0 %286 }
 0x227   :  { %v288_v28 = vsub.f32 %v287_v27, %v285_v26 }
 0x229   :  { %v289_v30 = vmul.f32 0.125, %v288_v28 }
 0x22b   :  { %v291_v31 = vsub.f32 %v290_v29, %v289_v30 }
 0x22d   :  { %293 = vst.msk [vmem:[#allocation10] sm:$0xff] %vm292_vm2, %v291_v31 }
 0x22e   :  { %297 = vsyncadd [#allocation4], 96  ;;  %s300_s28 = sshll.u32 %s545_s7, 4  ;;  %s467_s29 = smov [#allocation10]   ;;  %s301_s28 = int_to_ptr.hbm [resolvable:$true] %s300_s28 }
 0x22f   :  { %s298_s30 = sshll.u32 %s467_s29, 4  ;;  %s299_s30 = int_to_ptr.vmem [resolvable:$true] %s298_s30 }
 0x230   :  { %306 = dma.vmem_to_hbm [thread:$0]  %s299_s30, 32, %s301_s28, [#allocation4], %s461_s13, %s461_s13, %s462_s14  }
 0x231   :  { %455 = dma.done.wait [#allocation4], 128  }
 0x232   :  { %456 = vsyncadd [#allocation4], 4294967168 }
 0x233   :  { %311 = vsyncpa [#allocation3], 1 }
 0x234   :  { %312 = vsyncpa [#allocation6], 1 }
 0x235   :  { %313 = vsyncpa [#allocation9], 1 }
 0x236   :  { %314 = vsyncpa [#allocation4], 1 }

</bundles_post_ra>
